<compile_context>
chip_gen: v7x
topology: tpu7x:2x2x1
jax: 0.10.0
libtpu: 0.0.40
codegen_flags: <defaults>
</compile_context>

<pallas_src>
import functools

import jax
import jax.numpy as jnp
from jax.experimental import pallas as pl
from jax.experimental.pallas import tpu as pltpu

_LANE = 128  # TPU lane width: pad feature dims to this for lane-dense layout.


def _round_up(n, m):
    return ((n + m - 1) // m) * m


def _pad2d(x, rows, cols):
    """Zero-pad a 2-D array up to (rows, cols)."""
    r, c = x.shape
    return jnp.pad(x, ((0, rows - r), (0, cols - c)))


def _siamese_mlp_kernel(x_ref, w1_ref, b1_ref, w2_ref, b2_ref, o_ref):
    """One branch per grid step: o = relu(x @ W1 + b1) @ W2 + b2 (all f32)."""
    x = x_ref[...]                                                    # (B, DP)
    h = jnp.dot(x, w1_ref[...], preferred_element_type=jnp.float32)  # MXU
    h = jnp.maximum(h + b1_ref[...], 0.0)                            # VPU bias + ReLU
    o = jnp.dot(h, w2_ref[...], preferred_element_type=jnp.float32)  # MXU
    o_ref[...] = (o + b2_ref[...]).astype(o_ref.dtype)               # lane-dense store


@functools.partial(jax.jit, static_argnames=("emb_dim",))
def _siamese_forward(x_stack, w1_stack, b1_stack, w2_stack, b2_stack, emb_dim):
    """Single fused launch over both branches.  Stacked/padded operands:
       x_stack  (2, B, DP)   w1 (2, DP, HP)   b1 (2, 1, HP)
       w2 (2, HP, EP)        b2 (2, 1, EP)    -> out (2, B, EP)
    """
    _, B, DP = x_stack.shape
    HP = w1_stack.shape[2]
    EP = w2_stack.shape[2]

    out = pl.pallas_call(
        _siamese_mlp_kernel,
        out_shape=jax.ShapeDtypeStruct((2, B, EP), jnp.float32),
        grid=(2,),
        in_specs=[
            pl.BlockSpec((None, B, DP), lambda i: (i, 0, 0)),
            pl.BlockSpec((None, DP, HP), lambda i: (i, 0, 0)),
            pl.BlockSpec((None, 1, HP), lambda i: (i, 0, 0)),
            pl.BlockSpec((None, HP, EP), lambda i: (i, 0, 0)),
            pl.BlockSpec((None, 1, EP), lambda i: (i, 0, 0)),
        ],
        out_specs=pl.BlockSpec((None, B, EP), lambda i: (i, 0, 0)),
        compiler_params=pltpu.CompilerParams(
            # Branch axis is embarrassingly parallel -> 2 TCs on v7x,
            # neutral on v5e/v6e.
            dimension_semantics=("parallel",)),
    )(x_stack, w1_stack, b1_stack, w2_stack, b2_stack)

    # Slice the zero-padded embedding columns back off (tiny XLA slice).
    return out[0, :, :emb_dim], out[1, :, :emb_dim]


class SiameseNetworkPallas:
    """Mirrors SiameseNetwork.forward: returns (model1(input1), model2(input2)).

    Both branch parameter sets are zero-padded to lane width and stacked once
    at construction, so each forward is a single fused Pallas launch.
    """

    def __init__(self, params1, params2):
        w1a, b1a, w2a, b2a = params1
        w1b, b1b, w2b, b2b = params2
        self.d_in = w1a.shape[0]
        self.d_hidden = w1a.shape[1]
        self.d_out = w2a.shape[1]

        self.dp = _round_up(self.d_in, _LANE)
        self.hp = _round_up(self.d_hidden, _LANE)
        self.ep = _round_up(self.d_out, _LANE)

        self.w1 = jnp.stack([_pad2d(w1a, self.dp, self.hp),
                             _pad2d(w1b, self.dp, self.hp)])
        self.b1 = jnp.stack([_pad2d(b1a, 1, self.hp),
                             _pad2d(b1b, 1, self.hp)])
        self.w2 = jnp.stack([_pad2d(w2a, self.hp, self.ep),
                             _pad2d(w2b, self.hp, self.ep)])
        self.b2 = jnp.stack([_pad2d(b2a, 1, self.ep),
                             _pad2d(b2b, 1, self.ep)])

    def __call__(self, input1, input2):
        B = input1.shape[0]
        x_stack = jnp.stack([_pad2d(input1, B, self.dp),
                             _pad2d(input2, B, self.dp)])
        return _siamese_forward(x_stack, self.w1, self.b1, self.w2, self.b2,
                                emb_dim=self.d_out)


def _init_branch_params(key, d_in, d_hidden, d_out):
    """PyTorch nn.Linear-style uniform init (weights AND biases)."""
    k1, k2, k3, k4 = jax.random.split(key, 4)
    lim1 = 1.0 / jnp.sqrt(d_in)
    lim2 = 1.0 / jnp.sqrt(d_hidden)
    w1 = jax.random.uniform(k1, (d_in, d_hidden), jnp.float32, -lim1, lim1)
    b1 = jax.random.uniform(k2, (1, d_hidden), jnp.float32, -lim1, lim1)
    w2 = jax.random.uniform(k3, (d_hidden, d_out), jnp.float32, -lim2, lim2)
    b2 = jax.random.uniform(k4, (1, d_out), jnp.float32, -lim2, lim2)
    return (w1, b1, w2, b2)


if __name__ == "__main__":
    B, D, H, E = 8, 32, 64, 16   # batch, feature dim, hidden, embedding dim

    key = jax.random.PRNGKey(0)
    kx1, kx2, kp1, kp2 = jax.random.split(key, 4)

    input1 = jax.random.normal(kx1, (B, D), jnp.float32)
    input2 = jax.random.normal(kx2, (B, D), jnp.float32)

    params1 = _init_branch_params(kp1, D, H, E)
    params2 = _init_branch_params(kp2, D, H, E)

    net = SiameseNetworkPallas(params1, params2)
    out1, out2 = net(input1, input2)
    jax.block_until_ready((out1, out2))

    # Sanity check against plain-JAX reference of the same forward semantics.
    def ref_branch(x, w1, b1, w2, b2):
        return jnp.maximum(x @ w1 + b1, 0.0) @ w2 + b2

    r1 = ref_branch(input1, *params1)
    r2 = ref_branch(input2, *params2)
    assert out1.shape == (B, E) and out2.shape == (B, E)
    assert jnp.allclose(out1, r1, atol=1e-4, rtol=1e-4)
    assert jnp.allclose(out2, r2, atol=1e-4, rtol=1e-4)

    print("KERNEL_OK")
</pallas_src>

<mosaic_0001>
module attributes {stable_mosaic.version = 11 : i64} {
  func.func @_siamese_mlp_kernel(%arg0: i32, %arg1: memref<1x8x128xf32, #tpu.memory_space<vmem>>, %arg2: memref<1x128x128xf32, #tpu.memory_space<vmem>>, %arg3: memref<1x1x128xf32, #tpu.memory_space<vmem>>, %arg4: memref<1x128x128xf32, #tpu.memory_space<vmem>>, %arg5: memref<1x1x128xf32, #tpu.memory_space<vmem>>, %arg6: memref<1x8x128xf32, #tpu.memory_space<vmem>>) attributes {dimension_semantics = [#tpu.dimension_semantics<parallel>], iteration_bounds = array<i64: 2>, scalar_prefetch = 0 : i64, scratch_operands = 0 : i64, tpu.core_type = #tpu.core_type<tc>, window_params = [{transform_indices = @transform_0, window_bounds = array<i64: 1, 8, 128>}, {transform_indices = @transform_1, window_bounds = array<i64: 1, 128, 128>}, {transform_indices = @transform_2, window_bounds = array<i64: 1, 1, 128>}, {transform_indices = @transform_3, window_bounds = array<i64: 1, 128, 128>}, {transform_indices = @transform_4, window_bounds = array<i64: 1, 1, 128>}, {transform_indices = @transform_5, window_bounds = array<i64: 1, 8, 128>}]} {
    %c0 = arith.constant 0 : index
    %c0_0 = arith.constant 0 : index
    %c0_1 = arith.constant 0 : index
    %0 = vector.load %arg1[%c0, %c0_0, %c0_1] : memref<1x8x128xf32, #tpu.memory_space<vmem>>, vector<1x8x128xf32>
    %1 = vector.shape_cast %0 : vector<1x8x128xf32> to vector<8x128xf32>
    %c0_2 = arith.constant 0 : index
    %c0_3 = arith.constant 0 : index
    %c0_4 = arith.constant 0 : index
    %2 = vector.load %arg2[%c0_2, %c0_3, %c0_4] : memref<1x128x128xf32, #tpu.memory_space<vmem>>, vector<1x128x128xf32>
    %3 = vector.shape_cast %2 : vector<1x128x128xf32> to vector<128x128xf32>
    %cst = arith.constant dense<0.000000e+00> : vector<8x128xf32>
    %4 = tpu.matmul %1, %3, %cst {dimension_numbers = #tpu.dot_dimension_numbers<[1], [0], [0], [1], [0, 0, 1, 1], [], []>} : vector<8x128xf32>, vector<128x128xf32>, vector<8x128xf32> -> vector<8x128xf32>
    %c0_5 = arith.constant 0 : index
    %c0_6 = arith.constant 0 : index
    %c0_7 = arith.constant 0 : index
    %5 = vector.load %arg3[%c0_5, %c0_6, %c0_7] : memref<1x1x128xf32, #tpu.memory_space<vmem>>, vector<1x1x128xf32>
    %6 = vector.shape_cast %5 : vector<1x1x128xf32> to vector<1x128xf32>
    %7 = vector.broadcast %6 : vector<1x128xf32> to vector<8x128xf32>
    %8 = arith.addf %4, %7 : vector<8x128xf32>
    %cst_8 = arith.constant 0.000000e+00 : f32
    %9 = vector.broadcast %cst_8 : f32 to vector<8x128xf32>
    %10 = arith.maximumf %8, %9 : vector<8x128xf32>
    %c0_9 = arith.constant 0 : index
    %c0_10 = arith.constant 0 : index
    %c0_11 = arith.constant 0 : index
    %11 = vector.load %arg4[%c0_9, %c0_10, %c0_11] : memref<1x128x128xf32, #tpu.memory_space<vmem>>, vector<1x128x128xf32>
    %12 = vector.shape_cast %11 : vector<1x128x128xf32> to vector<128x128xf32>
    %cst_12 = arith.constant dense<0.000000e+00> : vector<8x128xf32>
    %13 = tpu.matmul %10, %12, %cst_12 {dimension_numbers = #tpu.dot_dimension_numbers<[1], [0], [0], [1], [0, 0, 1, 1], [], []>} : vector<8x128xf32>, vector<128x128xf32>, vector<8x128xf32> -> vector<8x128xf32>
    %c0_13 = arith.constant 0 : index
    %c0_14 = arith.constant 0 : index
    %c0_15 = arith.constant 0 : index
    %14 = vector.load %arg5[%c0_13, %c0_14, %c0_15] : memref<1x1x128xf32, #tpu.memory_space<vmem>>, vector<1x1x128xf32>
    %15 = vector.shape_cast %14 : vector<1x1x128xf32> to vector<1x128xf32>
    %16 = vector.broadcast %15 : vector<1x128xf32> to vector<8x128xf32>
    %17 = arith.addf %13, %16 : vector<8x128xf32>
    %c0_16 = arith.constant 0 : index
    %c0_17 = arith.constant 0 : index
    %c0_18 = arith.constant 0 : index
    %18 = vector.load %arg6[%c0_16, %c0_17, %c0_18] : memref<1x8x128xf32, #tpu.memory_space<vmem>>, vector<1x8x128xf32>
    %19 = vector.shape_cast %18 : vector<1x8x128xf32> to vector<8x128xf32>
    %20 = vector.shape_cast %17 : vector<8x128xf32> to vector<1x8x128xf32>
    tpu.vector_store %arg6[%c0_16, %c0_17, %c0_18], %20 {strides = array<i32>} : memref<1x8x128xf32, #tpu.memory_space<vmem>>, vector<1x8x128xf32>,
    return
  }
  func.func @transform_0(%arg0: i32) -> (i32, i32, i32) {
    %c0_i32 = arith.constant 0 : i32
    %c0_i32_0 = arith.constant 0 : i32
    %c0_i32_1 = arith.constant 0 : i32
    return %arg0, %c0_i32, %c0_i32_0 : i32, i32, i32
  }
  func.func @transform_1(%arg0: i32) -> (i32, i32, i32) {
    %c0_i32 = arith.constant 0 : i32
    %c0_i32_0 = arith.constant 0 : i32
    %c0_i32_1 = arith.constant 0 : i32
    return %arg0, %c0_i32, %c0_i32_0 : i32, i32, i32
  }
  func.func @transform_2(%arg0: i32) -> (i32, i32, i32) {
    %c0_i32 = arith.constant 0 : i32
    %c0_i32_0 = arith.constant 0 : i32
    %c0_i32_1 = arith.constant 0 : i32
    return %arg0, %c0_i32, %c0_i32_0 : i32, i32, i32
  }
  func.func @transform_3(%arg0: i32) -> (i32, i32, i32) {
    %c0_i32 = arith.constant 0 : i32
    %c0_i32_0 = arith.constant 0 : i32
    %c0_i32_1 = arith.constant 0 : i32
    return %arg0, %c0_i32, %c0_i32_0 : i32, i32, i32
  }
  func.func @transform_4(%arg0: i32) -> (i32, i32, i32) {
    %c0_i32 = arith.constant 0 : i32
    %c0_i32_0 = arith.constant 0 : i32
    %c0_i32_1 = arith.constant 0 : i32
    return %arg0, %c0_i32, %c0_i32_0 : i32, i32, i32
  }
  func.func @transform_5(%arg0: i32) -> (i32, i32, i32) {
    %c0_i32 = arith.constant 0 : i32
    %c0_i32_0 = arith.constant 0 : i32
    %c0_i32_1 = arith.constant 0 : i32
    return %arg0, %c0_i32, %c0_i32_0 : i32, i32, i32
  }
}

</mosaic_0001>

<bundles_post_ra>
// kernel: _siamese_forward.1
= control target key start
LH: loop header
LB: loop body
LE: loop exit
PB: predicated region body
PF: predicated region fallthrough
CT: control target
= control target key end

     0   :  { %10 = vsyncpa [#allocation3], 0  ;;  %s1313_s0 = inlined_call_operand.hbm [shape: f32[2,8,128], index: 0, kind: input, shape index: {}]   ;;  %s1314_s1 = inlined_call_operand.hbm [shape: f32[2,128,128], index: 1, kind: input, shape index: {}]   ;;  %s1315_s2 = inlined_call_operand.vmem [shape: f32[2,1,128], index: 2, kind: input, shape index: {}]   ;;  %s1316_s3 = inlined_call_operand.hbm [shape: f32[2,128,128], index: 3, kind: input, shape index: {}]   ;;  %s1317_s4 = inlined_call_operand.vmem [shape: f32[2,1,128], index: 4, kind: input, shape index: {}]   ;;  %s1318_s5 = inlined_call_operand.vmem [shape: f32[2,8,128], index: 5, kind: output, shape index: {}]  }
   0x1   :  { %12 = vsyncpa [#allocation3 + $0x1], 0 }
   0x2   :  { %13 = vsyncpa [#allocation5], 0 }
   0x3   :  { %15 = vsyncpa [#allocation5 + $0x1], 0  ;;  %s1056_s18 = smov 0   ;;  %s1058_s19 = smov 0  }
   0x4   :  { %s1060_s20 = smov 0   ;;  %s1062_s21 = smov 0  }
   0x5 LB: > { %s1075_s22 = sadd.s32 4294967295, %s1016_s21   ;;  %s1078_s23 = sadd.s32 1, %s1016_s21   ;;  %s1016_s21 = sphi %s1062_s21, %s1336_s21   ;;  %s1012_s20 = sphi %s1060_s20, %s1335_s20   ;;  %s1008_s19 = sphi %s1058_s19, %s1334_s19   ;;  %s1004_s18 = sphi %s1056_s18, %s1333_s18  }
   0x6   : > { %s25_s24 = ssub.s32 %s1016_s21, %s1078_s23  ;;  %s28_s25 = sadd.s32 1, %s1012_s20 }
   0x7   : > { %p26_p0 = scmp.eq.s32.totalorder %s25_s24, 0  ;;  %p35_p1 = scmp.ne.s32.totalorder %s1012_s20, %s1008_s19 }
   0x8   : > { %p36_p2 = scmp.eq.s32.totalorder %s1016_s21, 0  ;;  %p41_p3 = scmp.ne.s32.totalorder %s1008_s19, %s1004_s18 }
   0x9   : > { %s1088_s26 = scalar_select %p26_p0, %s1012_s20, %s28_s25  }
   0xa   : > { %p37_p4 = por %p36_p2, %p35_p1  ;;  %p42_p5 = scmp.eq.s32.totalorder %s1075_s22, 0 }
   0xb   : > { %p850_p6 = scmp.lt.s32.totalorder %s1016_s21, 2  ;;  %s1097_s28 = sand.u32 1, %s1012_s20  }
   0xc   : > { %p1092_p7 = por %p42_p5, %p41_p3  ;;  %s213_s30 = sand.u32 1, %s1016_s21  }
   0xd   : > { %p1099_p8 = pnand %p850_p6, %p37_p4  ;;  %s665_s6 = sshll.u32 %s1097_s28, 7 }
   0xe   : > { %s1324_s27 = scalar_select %p1092_p7, 1, 0 }
   0xf   : > { %s1325_s29 = scalar_select %p1099_p8, 1, 0 }
  0x10   : > { %s680_s7 = sshll.u32 %s1016_s21, 11  ;;  %s217_s8 = scalar_lea.vmem [#allocation4], %s665_s6 }
  0x11   : > { %s224_s9 = sshll.u32 %s217_s8, 4  ;;  %s1113_s12 = scalar_lea.hbm %s1314_s1, %s680_s7  ;;  %s1115_s9 = int_to_ptr.vmem [resolvable:$true] %s224_s9 }
  0x12   : > { %s1117_s13 = scalar_lea.sflag [#allocation5], %s213_s30  ;;  %s888_s14 = scalar_lea.hbm %s1113_s12, 2048 }
  0x13   : > { %p889_p9 = scmp.ne.s32.totalorder %s1113_s12, %s888_s14  ;;  %p1123_p10 = pneg %p1099_p8 }
  0x14   : > { %s893_s18 = scalar_lea.hbm %s1314_s1, 4096  ;;  %p894_p13 = scmp.lt.u32.totalorder %s1113_s12, %s1314_s1 }
  0x15   : > { %p891_p11 = pnand %p1123_p10, %p889_p9  ;;  %p895_p0 = scmp.lt.u32.totalorder %s893_s18, %s888_s14 }
  0x16   : > { %p897_p2 = scmp.lt.u32.totalorder %s888_s14, %s1113_s12 }
  0x17   : > { %p892_p12 = pneg %p891_p11  ;;  %p896_p1 = por %p895_p0, %p894_p13 }
  0x19   : > { %p898_p3 = por %p897_p2, %p896_p1 }
  0x1b   : > { %p899_p4 = pnand %p898_p3, %p892_p12 }
  0x1d   : > { %902 = shalt.err (!%p899_p4)
}
  0x1e   : > { %s903_s30 = scalar_lea.vmem %s1115_s9, 2048  ;;  %s1018_s8 = smov [#allocation4]  }
  0x1f   : > { %p904_p5 = scmp.ne.s32.totalorder %s1115_s9, %s903_s30  ;;  %s908_s10 = sshll.u32 %s1018_s8, 4  ;;  %s909_s10 = int_to_ptr.vmem [resolvable:$false] %s908_s10 }
  0x20   : > { %s910_s11 = scalar_lea.vmem %s909_s10, 4096  ;;  %p911_p11 = scmp.lt.s32.totalorder %s1115_s9, %s909_s10 }
  0x21   : > { %p906_p6 = pnand %p904_p5, %p1123_p10  ;;  %p912_p7 = scmp.lt.s32.totalorder %s910_s11, %s903_s30 }
  0x23   : > { %p907_p9 = pneg %p906_p6  ;;  %p913_p13 = por %p912_p7, %p911_p11 }
  0x25   : > { %p914_p0 = pnand %p913_p13, %p907_p9 }
  0x27   : > { %917 = shalt.err (!%p914_p0)
}
  0x28   : > { %s1320_s14 = smov 128   ;;  %s1321_s16 = smov 8  }
  0x29   : > { %846 = dma.hbm_to_vmem [thread:$0]  (!%p1099_p8), %s1113_s12, 2048, %s1115_s9, %s1117_s13, %s1320_s14, %s1320_s14, %s1321_s16  }
  0x2a   : > { %s1155_s24 = scalar_lea.hbm %s1316_s3, %s680_s7  ;;  %s244_s25 = scalar_lea.vmem [#allocation6], %s665_s6 }
  0x2b   : > { %s251_s30 = sshll.u32 %s244_s25, 4  ;;  %p671_p7 = scmp.ge.s32.totalorder %s1016_s21, 1  ;;  %s1160_s30 = int_to_ptr.vmem [resolvable:$true] %s251_s30 }
  0x2c   : > { %p265_p12 = scmp.lt.s32.totalorder %s1016_s21, 3  ;;  %s663_s8 = sshll.u32 %s1097_s28, 3 }
  0x2d   : > { %s664_s9 = sshll.u32 %s1016_s21, 7  ;;  %s199_s12 = scalar_lea.vmem [#allocation2], %s663_s8 }
  0x2e   : > { %p1164_p1 = pnand %p671_p7, %p265_p12  ;;  %s206_s11 = sshll.u32 %s199_s12, 4  ;;  %s207_s11 = int_to_ptr.vmem [resolvable:$true] %s206_s11 }
  0x2f   : > { %s1172_s7 = scalar_lea.hbm %s1313_s0, %s664_s9  ;;  %s196_s6 = scalar_lea.sflag [#allocation3], %s1097_s28 }
  0x30   : > { %s1327_s10 = scalar_select %p1164_p1, 1, 0 }
  0x31   : > { %s918_s18 = scalar_lea.hbm %s1172_s7, 128  ;;  %s923_s8 = scalar_lea.hbm %s1313_s0, 256 }
  0x32   : > { %p919_p2 = scmp.ne.s32.totalorder %s1172_s7, %s918_s18  ;;  %p924_p5 = scmp.lt.u32.totalorder %s1172_s7, %s1313_s0 }
  0x33   : > { %p925_p6 = scmp.lt.u32.totalorder %s923_s8, %s918_s18  ;;  %p927_p11 = scmp.lt.u32.totalorder %s918_s18, %s1172_s7 }
  0x34   : > { %p921_p3 = pnand %p919_p2, %p1123_p10 }
  0x35   : > { %p926_p9 = por %p925_p6, %p924_p5 }
  0x36   : > { %p922_p4 = pneg %p921_p3 }
  0x37   : > { %p928_p13 = por %p927_p11, %p926_p9 }
  0x39   : > { %p929_p0 = pnand %p928_p13, %p922_p4 }
  0x3b   : > { %932 = shalt.err (!%p929_p0)
}
  0x3c   : > { %s933_s28 = scalar_lea.vmem %s207_s11, 128  ;;  %s1021_s14 = smov [#allocation2]  }
  0x3d   : > { %p934_p7 = scmp.ne.s32.totalorder %s207_s11, %s933_s28  ;;  %s938_s9 = sshll.u32 %s1021_s14, 4  ;;  %s939_s9 = int_to_ptr.vmem [resolvable:$false] %s938_s9 }
  0x3e   : > { %s940_s17 = scalar_lea.vmem %s939_s9, 256  ;;  %p941_p3 = scmp.lt.s32.totalorder %s207_s11, %s939_s9 }
  0x3f   : > { %p936_p12 = pnand %p934_p7, %p1123_p10  ;;  %p942_p1 = scmp.lt.s32.totalorder %s940_s17, %s933_s28 }
  0x41   : > { %p937_p2 = pneg %p936_p12  ;;  %p943_p8 = por %p942_p1, %p941_p3 }
  0x43   : > { %p944_p5 = pnand %p943_p8, %p937_p2 }
  0x45   : > { %947 = shalt.err (!%p944_p5)
}
  0x46   : > { %p1328_p6 = scmp.ne.s32.totalorder %s1325_s29, 0  ;;  %s948_s16 = scalar_lea.hbm %s1155_s24, 2048 }
  0x47   : > { %p949_p4 = scmp.ne.s32.totalorder %s1155_s24, %s948_s16  ;;  %s953_s21 = scalar_lea.hbm %s1316_s3, 4096 }
  0x48   : > { %843 = dma.hbm_to_vmem [thread:$0]  (!%p1328_p6), %s1172_s7, 128, %s207_s11, %s196_s6  }
  0x49   : > { %p951_p9 = pnand %p949_p4, %p1123_p10  ;;  %p954_p8 = scmp.lt.u32.totalorder %s1155_s24, %s1316_s3 }
  0x4a   : > { %p955_p1 = scmp.lt.u32.totalorder %s953_s21, %s948_s16  ;;  %p957_p0 = scmp.lt.u32.totalorder %s948_s16, %s1155_s24 }
  0x4b   : > { %p952_p11 = pneg %p951_p9 }
  0x4c   : > { %p956_p13 = por %p955_p1, %p954_p8 }
  0x4e   : > { %p958_p7 = por %p957_p0, %p956_p13 }
  0x50   : > { %p959_p12 = pnand %p958_p7, %p952_p11 }
  0x52   : > { %962 = shalt.err (!%p959_p12)
}
  0x53   : > { %s963_s11 = scalar_lea.vmem %s1160_s30, 2048  ;;  %s1022_s7 = smov [#allocation6]  }
  0x54   : > { %p964_p2 = scmp.ne.s32.totalorder %s1160_s30, %s963_s11  ;;  %s968_s6 = sshll.u32 %s1022_s7, 4  ;;  %s969_s6 = int_to_ptr.vmem [resolvable:$false] %s968_s6 }
  0x55   : > { %s970_s28 = scalar_lea.vmem %s969_s6, 4096  ;;  %p971_p4 = scmp.lt.s32.totalorder %s1160_s30, %s969_s6 }
  0x56   : > { %p966_p3 = pnand %p964_p2, %p1123_p10  ;;  %p972_p9 = scmp.lt.s32.totalorder %s970_s28, %s963_s11 }
  0x58   : > { %p967_p5 = pneg %p966_p3  ;;  %p973_p8 = por %p972_p9, %p971_p4 }
  0x5a   : > { %p974_p1 = pnand %p973_p8, %p967_p5 }
  0x5c   : > { %977 = shalt.err (!%p974_p1)
}
  0x5d   : > { %s1329_s14 = smov 8   ;;  %s1330_s9 = smov 128  }
  0x5e   : > { %849 = dma.hbm_to_vmem [thread:$0]  (!%p1328_p6), %s1155_s24, 2048, %s1160_s30, %s1117_s13, %s1330_s9, %s1330_s9, %s1329_s14  }
  0x5f   : > { %p1331_p10 = scmp.ne.s32.totalorder %s1327_s10, 0 }
  0x60   : > { %s1220_s15 = sand.u32 (!%p1331_p10), 1, %s1008_s19   ;;  %p1332_p11 = scmp.ne.s32.totalorder (!%p1331_p10), %s1324_s27, 0 }
  0x61   : > { %269 = sbr.rel (%p1331_p10) target bundleno = 573 (0x23d), region = 40  ;;  %s672_s17 = sshll.u32 (!%p1331_p10), %s1220_s15, 3 }
  0x62   : > { %s272_s16 = scalar_lea.sflag (!%p1331_p10), [#allocation3], %s1220_s15  ;;  %s1224_s18 = scalar_lea.vmem (!%p1331_p10), [#allocation2], %s672_s17 }
  0x68   : > { %995 = dma.done.wait (%p1332_p11), %s272_s16, 128  }
  0x69   : > { %997 = vsyncadd (%p1332_p11), %s272_s16, 4294967168  ;;  %s280_s29 = sand.u32 1, %s1075_s22   ;;  %s673_s13 = sshll.u32 %s1220_s15, 7 }
  0x6a   : > { %s281_s24 = scalar_lea.sflag [#allocation5], %s280_s29  ;;  %s1232_s30 = scalar_lea.vmem [#allocation4], %s673_s13 }
  0x6b   : > { %999 = dma.done.wait (%p1332_p11), %s281_s24, 4096  }
  0x6c   : > { %1001 = vsyncadd (%p1332_p11), %s281_s24, 4294963200  ;;  %v1023_v0 = vmov 0.0|0.0   ;;  %vm1024_vm0 = vmmov 0   ;;  %v1025_v1 = vmov 0.0   ;;  %v346_v2 = vld [vmem:[%s1232_s30] sm:$0xff]  ;;  %v347_v3 = vld [vmem:[%s1232_s30 + $0x8] sm:$0xff] }
  0x6d   : > { %786 = vmatprep.subr.bf16.mxu0 %v1023_v0  ;;  %748 = vmatprep.mubr.msk.f32.mxu0 %vm1024_vm0, %v1025_v1  ;;  %v348_v4 = vld [vmem:[%s1232_s30 + $0x10] sm:$0xff]  ;;  %v787_v5 = vpack.c.bf16 %v347_v3, %v346_v2  ;;  %v349_v6 = vld [vmem:[%s1232_s30 + $0x18] sm:$0xff]  ;;  %v350_v8 = vld [vmem:[%s1232_s30 + $0x20] sm:$0xff]  ;;  %s1247_s27 = scalar_lea.vmem [#allocation6], %s673_s13  ;;  %p335_p6 = scmp.lt.s32.totalorder %s1075_s22, 1 }
  0x6e   : > { %810 = vmatprep.subr.bf16.mxu1 %v1023_v0  ;;  %783 = vmatprep.mubr.msk.f32.mxu1 %vm1024_vm0, %v1025_v1  ;;  %v790_v7 = vpack.c.bf16 %v349_v6, %v348_v4  ;;  %v351_v9 = vld [vmem:[%s1232_s30 + $0x28] sm:$0xff]  ;;  %v440_v10 = vld [vmem:[%s1247_s27] sm:$0xff]  ;;  %v442_v12 = vld [vmem:[%s1247_s27 + $0x10] sm:$0xff] }
  0x6f   : > { %788 = vmatpush3.bf16.msra.mxu0 %v787_v5  ;;  %v441_v11 = vld [vmem:[%s1247_s27 + $0x8] sm:$0xff]  ;;  %v443_v13 = vld [vmem:[%s1247_s27 + $0x18] sm:$0xff]  ;;  %v793_v14 = vpack.c.bf16 %v351_v9, %v350_v8  ;;  %v352_v16 = vld [vmem:[%s1232_s30 + $0x30] sm:$0xff]  ;;  %s1338_s22 = smov (!%p335_p6, %s1075_s22), 1 }
  0x70   : > { %789 = vmatprep.subr.bf16.mxu0 %v1023_v0  ;;  %v811_v15 = vpack.c.bf16 %v441_v11, %v440_v10  ;;  %v353_v17 = vld [vmem:[%s1232_s30 + $0x38] sm:$0xff]  ;;  %v814_v18 = vpack.c.bf16 %v443_v13, %v442_v12  ;;  %v444_v19 = vld [vmem:[%s1247_s27 + $0x20] sm:$0xff]  ;;  %v445_v20 = vld [vmem:[%s1247_s27 + $0x28] sm:$0xff]  ;;  %s337_s21 = scalar_lea.vmem %s1315_s2, %s1338_s22  ;;  %s340_s11 = scalar_lea.vmem %s1317_s4, %s1338_s22 }
  0x71   : > { %v796_v21 = vpack.c.bf16 %v353_v17, %v352_v16  ;;  %v354_v22 = vld [vmem:[%s1232_s30 + $0x40] sm:$0xff]  ;;  %v355_v23 = vld [vmem:[%s1232_s30 + $0x48] sm:$0xff]  ;;  %v817_v24 = vpack.c.bf16 %v445_v20, %v444_v19  ;;  %v446_v25 = vld [vmem:[%s1247_s27 + $0x30] sm:$0xff]  ;;  %s675_s7 = sshll.u32 %s1338_s22, 3 }
  0x72   : > { %812 = vmatpush3.bf16.msra.mxu1 %v811_v15  ;;  %v447_v26 = vld [vmem:[%s1247_s27 + $0x38] sm:$0xff]  ;;  %v799_v27 = vpack.c.bf16 %v355_v23, %v354_v22  ;;  %v356_v28 = vld [vmem:[%s1232_s30 + $0x50] sm:$0xff]  ;;  %v448_v31 = vld [vmem:[%s1247_s27 + $0x40] sm:$0xff]  ;;  %s344_s14 = scalar_lea.vmem %s1318_s5, %s675_s7 }
  0x73   : > { %791 = vmatpush3.bf16.msra.mxu0 %v790_v7  ;;  %813 = vmatprep.subr.bf16.mxu1 %v1023_v0  ;;  %v357_v29 = vld [vmem:[%s1232_s30 + $0x58] sm:$0xff]  ;;  %v820_v30 = vpack.c.bf16 %v447_v26, %v446_v25  ;;  %v449_v32 = vld [vmem:[%s1247_s27 + $0x48] sm:$0xff]  ;;  %v358_v34 = vld [vmem:[%s1232_s30 + $0x60] sm:$0xff] }
  0x74   : > { %792 = vmatprep.subr.bf16.mxu0 %v1023_v0  ;;  %v802_v33 = vpack.c.bf16 %v357_v29, %v356_v28  ;;  %v359_v35 = vld [vmem:[%s1232_s30 + $0x68] sm:$0xff]  ;;  %v823_v36 = vpack.c.bf16 %v449_v32, %v448_v31  ;;  %v450_v37 = vld [vmem:[%s1247_s27 + $0x50] sm:$0xff]  ;;  %v451_v38 = vld [vmem:[%s1247_s27 + $0x58] sm:$0xff] }
  0x75   : > { %v805_v39 = vpack.c.bf16 %v359_v35, %v358_v34  ;;  %v360_v40 = vld [vmem:[%s1232_s30 + $0x70] sm:$0xff]  ;;  %v361_v41 = vld [vmem:[%s1232_s30 + $0x78] sm:$0xff]  ;;  %v826_v42 = vpack.c.bf16 %v451_v38, %v450_v37  ;;  %v452_v43 = vld [vmem:[%s1247_s27 + $0x60] sm:$0xff] }
  0x76   : > { %815 = vmatpush3.bf16.msra.mxu1 %v814_v18  ;;  %v453_v44 = vld [vmem:[%s1247_s27 + $0x68] sm:$0xff]  ;;  %v808_v45 = vpack.c.bf16 %v361_v41, %v360_v40  ;;  %v345_v47 = vld [vmem:[%s1224_s18] sm:$0xff] }
  0x77   : > { %794 = vmatpush3.bf16.msra.mxu0 %v793_v14  ;;  %816 = vmatprep.subr.bf16.mxu1 %v1023_v0  ;;  %v829_v46 = vpack.c.bf16 %v453_v44, %v452_v43  ;;  %v454_v48 = vld [vmem:[%s1247_s27 + $0x70] sm:$0xff]  ;;  %v455_v49 = vld [vmem:[%s1247_s27 + $0x78] sm:$0xff] }
  0x78   : > { %795 = vmatprep.subr.bf16.mxu0 %v1023_v0  ;;  %v832_v50 = vpack.c.bf16 %v455_v49, %v454_v48  ;;  %v676_v51 = vld [vmem:[%s337_s21] ss:$0 sm:$0xff] }
  0x79   : > { %v677_v56 = vld [vmem:[%s340_s11] ss:$0 sm:$0xff] }
  0x7a   : > { %818 = vmatpush3.bf16.msra.mxu1 %v817_v24 }
  0x7b   : > { %797 = vmatpush3.bf16.msra.mxu0 %v796_v21  ;;  %819 = vmatprep.subr.bf16.mxu1 %v1023_v0 }
  0x7c   : > { %798 = vmatprep.subr.bf16.mxu0 %v1023_v0 }
  0x7e   : > { %821 = vmatpush3.bf16.msra.mxu1 %v820_v30 }
  0x7f   : > { %800 = vmatpush3.bf16.msra.mxu0 %v799_v27  ;;  %822 = vmatprep.subr.bf16.mxu1 %v1023_v0 }
  0x80   : > { %801 = vmatprep.subr.bf16.mxu0 %v1023_v0 }
  0x82   : > { %824 = vmatpush3.bf16.msra.mxu1 %v823_v36 }
  0x83   : > { %803 = vmatpush3.bf16.msra.mxu0 %v802_v33  ;;  %825 = vmatprep.subr.bf16.mxu1 %v1023_v0 }
  0x84   : > { %804 = vmatprep.subr.bf16.mxu0 %v1023_v0 }
  0x86   : > { %827 = vmatpush3.bf16.msra.mxu1 %v826_v42 }
  0x87   : > { %806 = vmatpush3.bf16.msra.mxu0 %v805_v39  ;;  %828 = vmatprep.subr.bf16.mxu1 %v1023_v0 }
  0x88   : > { %807 = vmatprep.subr.bf16.mxu0 %v1023_v0 }
  0x8a   : > { %830 = vmatpush3.bf16.msra.mxu1 %v829_v46 }
  0x8b   : > { %809 = vmatpush3.bf16.msra.mxu0 %v808_v45  ;;  %831 = vmatprep.subr.bf16.mxu1 %v1023_v0 }
  0x8e   : > { %749 = vmatmul.mubr.f32.vlgmr.msra.gmra.mrb[0].mxu0 %v345_v47  ;;  %833 = vmatpush3.bf16.msra.mxu1 %v832_v50 }
 0x161   : > { %v435_v52 = vpop.f32.mrb[0].mxu0 }
 0x162   : > { %v436_v53 = vadd.f32 %v676_v51, %v435_v52  ;;  %v750_v54 = vpop.f32.mrb[1].mxu0 }
 0x164   : > { %v439_v55 = vmax.f32 %v436_v53, 0.0 }
 0x166   : > { %784 = vmatmul.mubr.f32.vlgmr.msra.gmra.mrb[0].mxu1 %v439_v55 }
 0x239   : > { %v529_v57 = vpop.f32.mrb[0].mxu1 }
 0x23a   : > { %v530_v58 = vadd.f32 %v677_v56, %v529_v57  ;;  %v785_v59 = vpop.f32.mrb[1].mxu1 }
 0x23c   : > { %533 = vst [vmem:[%s344_s14] sm:$0xff] %v530_v58 }
 0x23d PF: > { %p18_p13 = scmp.ge.s32.totalorder %s1078_s23, 4   ;;  %s1333_s18 = smov %s1008_s19 }
 0x23e   : > { %s1334_s19 = smov %s1012_s20  ;;  %s1335_s20 = smov %s1088_s26 }
 0x23f   : > { %s1336_s21 = smov %s1078_s23  ;;  %20 = sbr.rel (!%p18_p13) target bundleno = 5 (0x5), region = 110 }
 0x246   :  { %553 = vsyncpa [#allocation3], 1 }
 0x247   :  { %555 = vsyncpa [#allocation3 + $0x1], 1 }
 0x248   :  { %556 = vsyncpa [#allocation5], 1 }
 0x249   :  { %558 = vsyncpa [#allocation5 + $0x1], 1 }

</bundles_post_ra>
